<compile_context>
chip_gen: v5e
topology: v5e:2x2
jax: 0.10.0
libtpu: 0.0.40
codegen_flags: <defaults>
</compile_context>

<pallas_src>
import functools
import math

import jax
import jax.numpy as jnp
from jax.experimental import pallas as pl
from jax.experimental.pallas import tpu as pltpu


def _softplus(x):
    # numerically stable softplus: max(x,0) + log1p(exp(-|x|))
    return jnp.maximum(x, 0.0) + jnp.log1p(jnp.exp(-jnp.abs(x)))


# ----------------------------------------------------------------------------
# Fused UncertaintyCalibration kernel (one batch tile per grid step; at the
# test sizes the grid is a single step).
# ----------------------------------------------------------------------------
def _uncertainty_kernel(x_ref, wcat_ref, bcat_ref,
                        w1_ref, b1_ref, w2_ref, b2_ref,
                        wmu_ref, wrho_ref, bmu_ref, brho_ref,
                        out_ref, kl_ref, *, S, C, prior_std):
    x = x_ref[...]                                        # (TB, H) f32

    # --- epistemic head: one wide matmul for all S samples ------------------
    # wcat is [H, S*C], column block s = sample s's (transposed) weights.
    ep_all = jnp.dot(x, wcat_ref[...],
                     preferred_element_type=jnp.float32) + bcat_ref[...]  # (TB, S*C)

    # single-pass mean / unbiased variance over samples via static lane slices
    s_sum = jnp.zeros((x.shape[0], C), jnp.float32)
    s_sq = jnp.zeros((x.shape[0], C), jnp.float32)
    for s in range(S):                                    # static unroll, S small
        o = ep_all[:, s * C:(s + 1) * C]
        s_sum = s_sum + o
        s_sq = s_sq + o * o
    ep_mean = s_sum * (1.0 / S)
    # unbiased (matches torch.var(dim=0)); guard S==1 against divide-by-zero
    var_scale = float(S) / float(max(S - 1, 1))
    ep_var = (s_sq * (1.0 / S) - ep_mean * ep_mean) * var_scale

    # --- aleatoric head: Linear -> ReLU -> Linear (single (H,2C) matmul) -----
    h = jnp.dot(x, w1_ref[...], preferred_element_type=jnp.float32) + b1_ref[...]
    h = jnp.maximum(h, 0.0)
    al = jnp.dot(h, w2_ref[...], preferred_element_type=jnp.float32) + b2_ref[...]
    al_mean = al[:, :C]                                   # in-vreg static slices
    al_var = jnp.exp(al[:, C:])

    # --- combine: lane-dense (TB, 2C) output [pred | uncertainty] -----------
    pred = (ep_mean + al_mean) * 0.5
    unc = ep_var + al_var
    out_ref[...] = jnp.concatenate([pred, unc], axis=-1).astype(out_ref.dtype)

    # --- KL( N(mu, softplus(rho)) || N(0, prior_std) ), summed ---------------
    # Written every step (constant output block); parameter-sized, negligible.
    inv_2var = 1.0 / (2.0 * prior_std * prior_std)
    log_prior = math.log(prior_std)

    def kl_terms(mu, rho):
        sigma = _softplus(rho)
        return (log_prior - jnp.log(sigma)
                + (sigma * sigma + mu * mu) * inv_2var - 0.5)

    kw = jnp.sum(kl_terms(wmu_ref[...], wrho_ref[...]), keepdims=True)   # (1,1)
    kb = jnp.sum(kl_terms(bmu_ref[...], brho_ref[...]), keepdims=True)   # (1,1)
    kl_ref[...] = kw + kb


# ----------------------------------------------------------------------------
# Module forward
# ----------------------------------------------------------------------------
def uncertainty_calibration_forward(params, x, eps_w, eps_b, prior_std=1.0):
    """x: [B, H]; eps_w: [S, C, H], eps_b: [S, C] standard-normal noise.

    Returns (pred [B, C], total_uncertainty [B, C], avg_kl scalar)."""
    B, H = x.shape
    C = params["w_mu"].shape[0]
    S = eps_w.shape[0]

    # ---- parameter-sized preprocessing (once, outside the kernel) ----------
    w_sigma = jax.nn.softplus(params["w_rho"])                # [C, H]
    b_sigma = jax.nn.softplus(params["b_rho"])                # [C]
    w_samp = params["w_mu"][None] + w_sigma[None] * eps_w     # [S, C, H]
    b_samp = params["b_mu"][None] + b_sigma[None] * eps_b     # [S, C]
    # concatenated [H, S*C]: column block s = sample s (in,out layout)
    w_cat = jnp.transpose(w_samp, (2, 0, 1)).reshape(H, S * C)
    b_cat = b_samp.reshape(1, S * C)

    w1_t = params["al_w1"].T                                  # [H, H] (in,out)
    b1 = params["al_b1"].reshape(1, H)
    w2_t = params["al_w2"].T                                  # [H, 2C] (in,out)
    b2 = params["al_b2"].reshape(1, 2 * C)

    wmu = params["w_mu"]                                      # [C, H]
    wrho = params["w_rho"]                                    # [C, H]
    bmu = params["b_mu"].reshape(1, C)
    brho = params["b_rho"].reshape(1, C)

    # single grid step at small B; tile only when B grows large
    if B <= 256:
        TB = B
    else:
        TB = 128
        assert B % TB == 0, "large batch must be a multiple of the 128 tile"
    n_tiles = B // TB

    kern = functools.partial(_uncertainty_kernel, S=S, C=C,
                             prior_std=float(prior_std))

    out, kl_arr = pl.pallas_call(
        kern,
        out_shape=(
            jax.ShapeDtypeStruct((B, 2 * C), jnp.float32),    # [pred | unc]
            jax.ShapeDtypeStruct((1, 1), jnp.float32),        # KL
        ),
        grid_spec=pltpu.PrefetchScalarGridSpec(
            num_scalar_prefetch=0,
            grid=(n_tiles,),
            in_specs=[
                pl.BlockSpec((TB, H), lambda i: (i, 0)),          # x (batch tile)
                pl.BlockSpec((H, S * C), lambda i: (0, 0)),       # concat sampled W
                pl.BlockSpec((1, S * C), lambda i: (0, 0)),       # concat sampled b
                pl.BlockSpec((H, H), lambda i: (0, 0)),           # aleatoric W1
                pl.BlockSpec((1, H), lambda i: (0, 0)),           # aleatoric b1
                pl.BlockSpec((H, 2 * C), lambda i: (0, 0)),       # aleatoric W2
                pl.BlockSpec((1, 2 * C), lambda i: (0, 0)),       # aleatoric b2
                pl.BlockSpec((C, H), lambda i: (0, 0)),           # w_mu  (KL)
                pl.BlockSpec((C, H), lambda i: (0, 0)),           # w_rho (KL)
                pl.BlockSpec((1, C), lambda i: (0, 0)),           # b_mu  (KL)
                pl.BlockSpec((1, C), lambda i: (0, 0)),           # b_rho (KL)
            ],
            out_specs=[
                pl.BlockSpec((TB, 2 * C), lambda i: (i, 0)),
                pl.BlockSpec((1, 1), lambda i: (0, 0)),
            ],
        ),
        compiler_params=pltpu.CompilerParams(
            dimension_semantics=("arbitrary",)),
    )(x, w_cat, b_cat, w1_t, b1, w2_t, b2, wmu, wrho, bmu, brho)

    pred = out[:, :C]
    unc = out[:, C:]
    # total_kl / num_samples == single-sample KL (KL does not depend on noise)
    avg_kl = kl_arr[0, 0]
    return pred, unc, avg_kl


# ----------------------------------------------------------------------------
# Pure-JAX reference (mirrors the PyTorch forward with the same noise)
# ----------------------------------------------------------------------------
def reference_forward(params, x, eps_w, eps_b, prior_std=1.0):
    wmu, wrho = params["w_mu"], params["w_rho"]
    bmu, brho = params["b_mu"], params["b_rho"]
    wsig = jax.nn.softplus(wrho)
    bsig = jax.nn.softplus(brho)
    S = eps_w.shape[0]

    preds = []
    for s in range(S):
        W = wmu + wsig * eps_w[s]
        bv = bmu + bsig * eps_b[s]
        preds.append(x @ W.T + bv)
    P = jnp.stack(preds, 0)
    ep_mean = jnp.mean(P, axis=0)
    ep_var = jnp.var(P, axis=0, ddof=1)

    def kl(mu, sigma):
        return jnp.sum(jnp.log(prior_std / sigma)
                       + (sigma ** 2 + mu ** 2) / (2.0 * prior_std ** 2) - 0.5)

    total_kl = kl(wmu, wsig) + kl(bmu, bsig)

    h = jnp.maximum(x @ params["al_w1"].T + params["al_b1"], 0.0)
    al = h @ params["al_w2"].T + params["al_b2"]
    C = wmu.shape[0]
    al_mean = al[:, :C]
    al_var = jnp.exp(al[:, C:])
    pred = (ep_mean + al_mean) / 2.0
    unc = ep_var + al_var
    return pred, unc, total_kl


if __name__ == "__main__":
    B, H, C, S = 16, 32, 8, 10               # batch, hidden_dim, num_classes, num_samples
    root = jax.random.PRNGKey(0)
    ks = jax.random.split(root, 11)
    bound = 1.0 / (H ** 0.5)

    params = {
        "w_mu": 0.1 * jax.random.normal(ks[0], (C, H), jnp.float32),
        "w_rho": -1.0 + 0.2 * jax.random.normal(ks[1], (C, H), jnp.float32),
        "b_mu": 0.1 * jax.random.normal(ks[2], (C,), jnp.float32),
        "b_rho": -1.0 + 0.2 * jax.random.normal(ks[3], (C,), jnp.float32),
        "al_w1": jax.random.uniform(ks[4], (H, H), jnp.float32, -bound, bound),
        "al_b1": jax.random.uniform(ks[5], (H,), jnp.float32, -bound, bound),
        "al_w2": jax.random.uniform(ks[6], (2 * C, H), jnp.float32, -bound, bound),
        "al_b2": jax.random.uniform(ks[7], (2 * C,), jnp.float32, -bound, bound),
    }
    x = jax.random.normal(ks[8], (B, H), jnp.float32)
    eps_w = jax.random.normal(ks[9], (S, C, H), jnp.float32)
    eps_b = jax.random.normal(ks[10], (S, C), jnp.float32)

    pred, unc, kl = uncertainty_calibration_forward(params, x, eps_w, eps_b)
    jax.block_until_ready((pred, unc, kl))

    pred_r, unc_r, kl_r = reference_forward(params, x, eps_w, eps_b)

    assert pred.shape == (B, C)
    assert unc.shape == (B, C)
    assert kl.shape == ()
    assert bool(jnp.all(unc > 0.0))
    assert jnp.allclose(pred, pred_r, rtol=1e-2, atol=1e-2)
    assert jnp.allclose(unc, unc_r, rtol=1e-2, atol=1e-2)
    assert jnp.allclose(kl, kl_r, rtol=1e-3, atol=1e-3)

    print("KERNEL_OK")
</pallas_src>

<mosaic_0001>
module attributes {stable_mosaic.version = 11 : i64} {
  func.func @_uncertainty_kernel(%arg0: i32, %arg1: memref<16x32xf32, #tpu.memory_space<vmem>>, %arg2: memref<32x80xf32, #tpu.memory_space<vmem>>, %arg3: memref<1x80xf32, #tpu.memory_space<vmem>>, %arg4: memref<32x32xf32, #tpu.memory_space<vmem>>, %arg5: memref<1x32xf32, #tpu.memory_space<vmem>>, %arg6: memref<32x16xf32, #tpu.memory_space<vmem>>, %arg7: memref<1x16xf32, #tpu.memory_space<vmem>>, %arg8: memref<8x32xf32, #tpu.memory_space<vmem>>, %arg9: memref<8x32xf32, #tpu.memory_space<vmem>>, %arg10: memref<1x8xf32, #tpu.memory_space<vmem>>, %arg11: memref<1x8xf32, #tpu.memory_space<vmem>>, %arg12: memref<16x16xf32, #tpu.memory_space<vmem>>, %arg13: memref<1x1xf32, #tpu.memory_space<vmem>>) attributes {dimension_semantics = [#tpu.dimension_semantics<arbitrary>], iteration_bounds = array<i64: 1>, scalar_prefetch = 0 : i64, scratch_operands = 0 : i64, tpu.core_type = #tpu.core_type<tc>, window_params = [{transform_indices = @transform_0, window_bounds = array<i64: 16, 32>}, {pipeline_mode = #tpu.pipeline_mode<synchronous>, transform_indices = @transform_1, window_bounds = array<i64: 32, 80>}, {pipeline_mode = #tpu.pipeline_mode<synchronous>, transform_indices = @transform_2, window_bounds = array<i64: 1, 80>}, {pipeline_mode = #tpu.pipeline_mode<synchronous>, transform_indices = @transform_3, window_bounds = array<i64: 32, 32>}, {pipeline_mode = #tpu.pipeline_mode<synchronous>, transform_indices = @transform_4, window_bounds = array<i64: 1, 32>}, {pipeline_mode = #tpu.pipeline_mode<synchronous>, transform_indices = @transform_5, window_bounds = array<i64: 32, 16>}, {pipeline_mode = #tpu.pipeline_mode<synchronous>, transform_indices = @transform_6, window_bounds = array<i64: 1, 16>}, {pipeline_mode = #tpu.pipeline_mode<synchronous>, transform_indices = @transform_7, window_bounds = array<i64: 8, 32>}, {pipeline_mode = #tpu.pipeline_mode<synchronous>, transform_indices = @transform_8, window_bounds = array<i64: 8, 32>}, {pipeline_mode = #tpu.pipeline_mode<synchronous>, transform_indices = @transform_9, window_bounds = array<i64: 1, 8>}, {pipeline_mode = #tpu.pipeline_mode<synchronous>, transform_indices = @transform_10, window_bounds = array<i64: 1, 8>}, {transform_indices = @transform_11, window_bounds = array<i64: 16, 16>}, {pipeline_mode = #tpu.pipeline_mode<synchronous>, transform_indices = @transform_12, window_bounds = array<i64: 1, 1>}]} {
    %c0 = arith.constant 0 : index
    %c0_0 = arith.constant 0 : index
    %0 = vector.load %arg1[%c0, %c0_0] : memref<16x32xf32, #tpu.memory_space<vmem>>, vector<16x32xf32>
    %c0_1 = arith.constant 0 : index
    %c0_2 = arith.constant 0 : index
    %1 = vector.load %arg2[%c0_1, %c0_2] : memref<32x80xf32, #tpu.memory_space<vmem>>, vector<32x80xf32>
    %cst = arith.constant dense<0.000000e+00> : vector<16x80xf32>
    %2 = tpu.matmul %0, %1, %cst {dimension_numbers = #tpu.dot_dimension_numbers<[1], [0], [0], [1], [0, 0, 1, 1], [], []>} : vector<16x32xf32>, vector<32x80xf32>, vector<16x80xf32> -> vector<16x80xf32>
    %c0_3 = arith.constant 0 : index
    %c0_4 = arith.constant 0 : index
    %3 = vector.load %arg3[%c0_3, %c0_4] : memref<1x80xf32, #tpu.memory_space<vmem>>, vector<1x80xf32>
    %4 = vector.broadcast %3 : vector<1x80xf32> to vector<16x80xf32>
    %5 = arith.addf %2, %4 : vector<16x80xf32>
    %cst_5 = arith.constant 0.000000e+00 : f32
    %6 = vector.broadcast %cst_5 : f32 to vector<16x8xf32>
    %cst_6 = arith.constant 0.000000e+00 : f32
    %7 = vector.broadcast %cst_6 : f32 to vector<16x8xf32>
    %8 = vector.extract_strided_slice %5 {offsets = [0, 0], sizes = [16, 8], strides = [1, 1]} : vector<16x80xf32> to vector<16x8xf32>
    %9 = arith.addf %6, %8 : vector<16x8xf32>
    %10 = arith.mulf %8, %8 : vector<16x8xf32>
    %11 = arith.addf %7, %10 : vector<16x8xf32>
    %12 = vector.extract_strided_slice %5 {offsets = [0, 8], sizes = [16, 8], strides = [1, 1]} : vector<16x80xf32> to vector<16x8xf32>
    %13 = arith.addf %9, %12 : vector<16x8xf32>
    %14 = arith.mulf %12, %12 : vector<16x8xf32>
    %15 = arith.addf %11, %14 : vector<16x8xf32>
    %16 = vector.extract_strided_slice %5 {offsets = [0, 16], sizes = [16, 8], strides = [1, 1]} : vector<16x80xf32> to vector<16x8xf32>
    %17 = arith.addf %13, %16 : vector<16x8xf32>
    %18 = arith.mulf %16, %16 : vector<16x8xf32>
    %19 = arith.addf %15, %18 : vector<16x8xf32>
    %20 = vector.extract_strided_slice %5 {offsets = [0, 24], sizes = [16, 8], strides = [1, 1]} : vector<16x80xf32> to vector<16x8xf32>
    %21 = arith.addf %17, %20 : vector<16x8xf32>
    %22 = arith.mulf %20, %20 : vector<16x8xf32>
    %23 = arith.addf %19, %22 : vector<16x8xf32>
    %24 = vector.extract_strided_slice %5 {offsets = [0, 32], sizes = [16, 8], strides = [1, 1]} : vector<16x80xf32> to vector<16x8xf32>
    %25 = arith.addf %21, %24 : vector<16x8xf32>
    %26 = arith.mulf %24, %24 : vector<16x8xf32>
    %27 = arith.addf %23, %26 : vector<16x8xf32>
    %28 = vector.extract_strided_slice %5 {offsets = [0, 40], sizes = [16, 8], strides = [1, 1]} : vector<16x80xf32> to vector<16x8xf32>
    %29 = arith.addf %25, %28 : vector<16x8xf32>
    %30 = arith.mulf %28, %28 : vector<16x8xf32>
    %31 = arith.addf %27, %30 : vector<16x8xf32>
    %32 = vector.extract_strided_slice %5 {offsets = [0, 48], sizes = [16, 8], strides = [1, 1]} : vector<16x80xf32> to vector<16x8xf32>
    %33 = arith.addf %29, %32 : vector<16x8xf32>
    %34 = arith.mulf %32, %32 : vector<16x8xf32>
    %35 = arith.addf %31, %34 : vector<16x8xf32>
    %36 = vector.extract_strided_slice %5 {offsets = [0, 56], sizes = [16, 8], strides = [1, 1]} : vector<16x80xf32> to vector<16x8xf32>
    %37 = arith.addf %33, %36 : vector<16x8xf32>
    %38 = arith.mulf %36, %36 : vector<16x8xf32>
    %39 = arith.addf %35, %38 : vector<16x8xf32>
    %40 = vector.extract_strided_slice %5 {offsets = [0, 64], sizes = [16, 8], strides = [1, 1]} : vector<16x80xf32> to vector<16x8xf32>
    %41 = arith.addf %37, %40 : vector<16x8xf32>
    %42 = arith.mulf %40, %40 : vector<16x8xf32>
    %43 = arith.addf %39, %42 : vector<16x8xf32>
    %44 = vector.extract_strided_slice %5 {offsets = [0, 72], sizes = [16, 8], strides = [1, 1]} : vector<16x80xf32> to vector<16x8xf32>
    %45 = arith.addf %41, %44 : vector<16x8xf32>
    %46 = arith.mulf %44, %44 : vector<16x8xf32>
    %47 = arith.addf %43, %46 : vector<16x8xf32>
    %cst_7 = arith.constant 1.000000e-01 : f32
    %48 = vector.broadcast %cst_7 : f32 to vector<16x8xf32>
    %49 = arith.mulf %45, %48 : vector<16x8xf32>
    %cst_8 = arith.constant 1.000000e-01 : f32
    %50 = vector.broadcast %cst_8 : f32 to vector<16x8xf32>
    %51 = arith.mulf %47, %50 : vector<16x8xf32>
    %52 = arith.mulf %49, %49 : vector<16x8xf32>
    %53 = arith.subf %51, %52 : vector<16x8xf32>
    %cst_9 = arith.constant 1.11111116 : f32
    %54 = vector.broadcast %cst_9 : f32 to vector<16x8xf32>
    %55 = arith.mulf %53, %54 : vector<16x8xf32>
    %c0_10 = arith.constant 0 : index
    %c0_11 = arith.constant 0 : index
    %56 = vector.load %arg4[%c0_10, %c0_11] : memref<32x32xf32, #tpu.memory_space<vmem>>, vector<32x32xf32>
    %cst_12 = arith.constant dense<0.000000e+00> : vector<16x32xf32>
    %57 = tpu.matmul %0, %56, %cst_12 {dimension_numbers = #tpu.dot_dimension_numbers<[1], [0], [0], [1], [0, 0, 1, 1], [], []>} : vector<16x32xf32>, vector<32x32xf32>, vector<16x32xf32> -> vector<16x32xf32>
    %c0_13 = arith.constant 0 : index
    %c0_14 = arith.constant 0 : index
    %58 = vector.load %arg5[%c0_13, %c0_14] : memref<1x32xf32, #tpu.memory_space<vmem>>, vector<1x32xf32>
    %59 = vector.broadcast %58 : vector<1x32xf32> to vector<16x32xf32>
    %60 = arith.addf %57, %59 : vector<16x32xf32>
    %cst_15 = arith.constant 0.000000e+00 : f32
    %61 = vector.broadcast %cst_15 : f32 to vector<16x32xf32>
    %62 = arith.maximumf %60, %61 : vector<16x32xf32>
    %c0_16 = arith.constant 0 : index
    %c0_17 = arith.constant 0 : index
    %63 = vector.load %arg6[%c0_16, %c0_17] : memref<32x16xf32, #tpu.memory_space<vmem>>, vector<32x16xf32>
    %cst_18 = arith.constant dense<0.000000e+00> : vector<16x16xf32>
    %64 = tpu.matmul %62, %63, %cst_18 {dimension_numbers = #tpu.dot_dimension_numbers<[1], [0], [0], [1], [0, 0, 1, 1], [], []>} : vector<16x32xf32>, vector<32x16xf32>, vector<16x16xf32> -> vector<16x16xf32>
    %c0_19 = arith.constant 0 : index
    %c0_20 = arith.constant 0 : index
    %65 = vector.load %arg7[%c0_19, %c0_20] : memref<1x16xf32, #tpu.memory_space<vmem>>, vector<1x16xf32>
    %66 = vector.broadcast %65 : vector<1x16xf32> to vector<16x16xf32>
    %67 = arith.addf %64, %66 : vector<16x16xf32>
    %68 = vector.extract_strided_slice %67 {offsets = [0, 0], sizes = [16, 8], strides = [1, 1]} : vector<16x16xf32> to vector<16x8xf32>
    %69 = vector.extract_strided_slice %67 {offsets = [0, 8], sizes = [16, 8], strides = [1, 1]} : vector<16x16xf32> to vector<16x8xf32>
    %70 = math.exp %69 : vector<16x8xf32>
    %71 = arith.addf %49, %68 : vector<16x8xf32>
    %cst_21 = arith.constant 5.000000e-01 : f32
    %72 = vector.broadcast %cst_21 : f32 to vector<16x8xf32>
    %73 = arith.mulf %71, %72 : vector<16x8xf32>
    %74 = arith.addf %55, %70 : vector<16x8xf32>
    %75 = tpu.concatenate %73, %74 in 1 : vector<16x8xf32>, vector<16x8xf32> -> vector<16x16xf32>
    %c0_22 = arith.constant 0 : index
    %c0_23 = arith.constant 0 : index
    %76 = vector.load %arg12[%c0_22, %c0_23] : memref<16x16xf32, #tpu.memory_space<vmem>>, vector<16x16xf32>
    tpu.vector_store %arg12[%c0_22, %c0_23], %75 {strides = array<i32>} : memref<16x16xf32, #tpu.memory_space<vmem>>, vector<16x16xf32>,
    %c0_24 = arith.constant 0 : index
    %c0_25 = arith.constant 0 : index
    %77 = vector.load %arg8[%c0_24, %c0_25] : memref<8x32xf32, #tpu.memory_space<vmem>>, vector<8x32xf32>
    %c0_26 = arith.constant 0 : index
    %c0_27 = arith.constant 0 : index
    %78 = vector.load %arg9[%c0_26, %c0_27] : memref<8x32xf32, #tpu.memory_space<vmem>>, vector<8x32xf32>
    %cst_28 = arith.constant 0.000000e+00 : f32
    %79 = vector.broadcast %cst_28 : f32 to vector<8x32xf32>
    %80 = arith.maximumf %78, %79 : vector<8x32xf32>
    %81 = math.absf %78 : vector<8x32xf32>
    %cst_29 = arith.constant 0.000000e+00 : f32
    %82 = vector.broadcast %cst_29 : f32 to vector<8x32xf32>
    %83 = arith.subf %82, %81 : vector<8x32xf32>
    %84 = math.exp %83 : vector<8x32xf32>
    %85 = math.log1p %84 : vector<8x32xf32>
    %86 = arith.addf %80, %85 : vector<8x32xf32>
    %87 = math.log %86 : vector<8x32xf32>
    %cst_30 = arith.constant 0.000000e+00 : f32
    %88 = vector.broadcast %cst_30 : f32 to vector<8x32xf32>
    %89 = arith.subf %88, %87 : vector<8x32xf32>
    %90 = arith.mulf %86, %86 : vector<8x32xf32>
    %91 = arith.mulf %77, %77 : vector<8x32xf32>
    %92 = arith.addf %90, %91 : vector<8x32xf32>
    %cst_31 = arith.constant 5.000000e-01 : f32
    %93 = vector.broadcast %cst_31 : f32 to vector<8x32xf32>
    %94 = arith.mulf %92, %93 : vector<8x32xf32>
    %95 = arith.addf %89, %94 : vector<8x32xf32>
    %cst_32 = arith.constant 5.000000e-01 : f32
    %96 = vector.broadcast %cst_32 : f32 to vector<8x32xf32>
    %97 = arith.subf %95, %96 : vector<8x32xf32>
    %98 = vector.shape_cast %97 : vector<8x32xf32> to vector<1x8x32xf32>
    %cst_33 = arith.constant dense<0.000000e+00> : vector<1xf32>
    %99 = vector.multi_reduction <add>, %98, %cst_33 [1, 2] : vector<1x8x32xf32> to vector<1xf32>
    %100 = vector.shape_cast %99 : vector<1xf32> to vector<1x1x1xf32>
    %101 = vector.extract %100[0, 0, 0] : f32 from vector<1x1x1xf32>
    %102 = vector.broadcast %101 : f32 to vector<1x1xf32>
    %c0_34 = arith.constant 0 : index
    %c0_35 = arith.constant 0 : index
    %103 = vector.load %arg10[%c0_34, %c0_35] : memref<1x8xf32, #tpu.memory_space<vmem>>, vector<1x8xf32>
    %c0_36 = arith.constant 0 : index
    %c0_37 = arith.constant 0 : index
    %104 = vector.load %arg11[%c0_36, %c0_37] : memref<1x8xf32, #tpu.memory_space<vmem>>, vector<1x8xf32>
    %cst_38 = arith.constant 0.000000e+00 : f32
    %105 = vector.broadcast %cst_38 : f32 to vector<1x8xf32>
    %106 = arith.maximumf %104, %105 : vector<1x8xf32>
    %107 = math.absf %104 : vector<1x8xf32>
    %cst_39 = arith.constant 0.000000e+00 : f32
    %108 = vector.broadcast %cst_39 : f32 to vector<1x8xf32>
    %109 = arith.subf %108, %107 : vector<1x8xf32>
    %110 = math.exp %109 : vector<1x8xf32>
    %111 = math.log1p %110 : vector<1x8xf32>
    %112 = arith.addf %106, %111 : vector<1x8xf32>
    %113 = math.log %112 : vector<1x8xf32>
    %cst_40 = arith.constant 0.000000e+00 : f32
    %114 = vector.broadcast %cst_40 : f32 to vector<1x8xf32>
    %115 = arith.subf %114, %113 : vector<1x8xf32>
    %116 = arith.mulf %112, %112 : vector<1x8xf32>
    %117 = arith.mulf %103, %103 : vector<1x8xf32>
    %118 = arith.addf %116, %117 : vector<1x8xf32>
    %cst_41 = arith.constant 5.000000e-01 : f32
    %119 = vector.broadcast %cst_41 : f32 to vector<1x8xf32>
    %120 = arith.mulf %118, %119 : vector<1x8xf32>
    %121 = arith.addf %115, %120 : vector<1x8xf32>
    %cst_42 = arith.constant 5.000000e-01 : f32
    %122 = vector.broadcast %cst_42 : f32 to vector<1x8xf32>
    %123 = arith.subf %121, %122 : vector<1x8xf32>
    %124 = vector.shape_cast %123 : vector<1x8xf32> to vector<1x1x8xf32>
    %cst_43 = arith.constant dense<0.000000e+00> : vector<1xf32>
    %125 = vector.multi_reduction <add>, %124, %cst_43 [1, 2] : vector<1x1x8xf32> to vector<1xf32>
    %126 = vector.shape_cast %125 : vector<1xf32> to vector<1x1x1xf32>
    %127 = vector.extract %126[0, 0, 0] : f32 from vector<1x1x1xf32>
    %128 = vector.broadcast %127 : f32 to vector<1x1xf32>
    %129 = arith.addf %102, %128 : vector<1x1xf32>
    %c0_44 = arith.constant 0 : index
    %c0_45 = arith.constant 0 : index
    %130 = vector.load %arg13[%c0_44, %c0_45] : memref<1x1xf32, #tpu.memory_space<vmem>>, vector<1x1xf32>
    tpu.vector_store %arg13[%c0_44, %c0_45], %129 {strides = array<i32>} : memref<1x1xf32, #tpu.memory_space<vmem>>, vector<1x1xf32>,
    return
  }
  func.func @transform_0(%arg0: i32) -> (i32, i32) {
    %c0_i32 = arith.constant 0 : i32
    %c0_i32_0 = arith.constant 0 : i32
    return %arg0, %c0_i32 : i32, i32
  }
  func.func @transform_1(%arg0: i32) -> (i32, i32) {
    %c0_i32 = arith.constant 0 : i32
    %c0_i32_0 = arith.constant 0 : i32
    %c0_i32_1 = arith.constant 0 : i32
    return %c0_i32, %c0_i32_0 : i32, i32
  }
  func.func @transform_2(%arg0: i32) -> (i32, i32) {
    %c0_i32 = arith.constant 0 : i32
    %c0_i32_0 = arith.constant 0 : i32
    %c0_i32_1 = arith.constant 0 : i32
    return %c0_i32, %c0_i32_0 : i32, i32
  }
  func.func @transform_3(%arg0: i32) -> (i32, i32) {
    %c0_i32 = arith.constant 0 : i32
    %c0_i32_0 = arith.constant 0 : i32
    %c0_i32_1 = arith.constant 0 : i32
    return %c0_i32, %c0_i32_0 : i32, i32
  }
  func.func @transform_4(%arg0: i32) -> (i32, i32) {
    %c0_i32 = arith.constant 0 : i32
    %c0_i32_0 = arith.constant 0 : i32
    %c0_i32_1 = arith.constant 0 : i32
    return %c0_i32, %c0_i32_0 : i32, i32
  }
  func.func @transform_5(%arg0: i32) -> (i32, i32) {
    %c0_i32 = arith.constant 0 : i32
    %c0_i32_0 = arith.constant 0 : i32
    %c0_i32_1 = arith.constant 0 : i32
    return %c0_i32, %c0_i32_0 : i32, i32
  }
  func.func @transform_6(%arg0: i32) -> (i32, i32) {
    %c0_i32 = arith.constant 0 : i32
    %c0_i32_0 = arith.constant 0 : i32
    %c0_i32_1 = arith.constant 0 : i32
    return %c0_i32, %c0_i32_0 : i32, i32
  }
  func.func @transform_7(%arg0: i32) -> (i32, i32) {
    %c0_i32 = arith.constant 0 : i32
    %c0_i32_0 = arith.constant 0 : i32
    %c0_i32_1 = arith.constant 0 : i32
    return %c0_i32, %c0_i32_0 : i32, i32
  }
  func.func @transform_8(%arg0: i32) -> (i32, i32) {
    %c0_i32 = arith.constant 0 : i32
    %c0_i32_0 = arith.constant 0 : i32
    %c0_i32_1 = arith.constant 0 : i32
    return %c0_i32, %c0_i32_0 : i32, i32
  }
  func.func @transform_9(%arg0: i32) -> (i32, i32) {
    %c0_i32 = arith.constant 0 : i32
    %c0_i32_0 = arith.constant 0 : i32
    %c0_i32_1 = arith.constant 0 : i32
    return %c0_i32, %c0_i32_0 : i32, i32
  }
  func.func @transform_10(%arg0: i32) -> (i32, i32) {
    %c0_i32 = arith.constant 0 : i32
    %c0_i32_0 = arith.constant 0 : i32
    %c0_i32_1 = arith.constant 0 : i32
    return %c0_i32, %c0_i32_0 : i32, i32
  }
  func.func @transform_11(%arg0: i32) -> (i32, i32) {
    %c0_i32 = arith.constant 0 : i32
    %c0_i32_0 = arith.constant 0 : i32
    return %arg0, %c0_i32 : i32, i32
  }
  func.func @transform_12(%arg0: i32) -> (i32, i32) {
    %c0_i32 = arith.constant 0 : i32
    %c0_i32_0 = arith.constant 0 : i32
    %c0_i32_1 = arith.constant 0 : i32
    return %c0_i32, %c0_i32_0 : i32, i32
  }
}

</mosaic_0001>

<bundles_post_ra>
// kernel: tpu_custom_call.1
= control target key start
LH: loop header
LB: loop body
LE: loop exit
PB: predicated region body
PF: predicated region fallthrough
CT: control target
= control target key end

     0   :  { %18 = vsyncpa [#allocation3], 0  ;;  %s934_s0 = inlined_call_operand.vmem [shape: f32[16,32], index: 0, kind: input, shape index: {}]   ;;  %s935_s1 = inlined_call_operand.vmem [shape: f32[32,80], index: 1, kind: input, shape index: {}]   ;;  %s936_s2 = inlined_call_operand.vmem [shape: f32[1,80], index: 2, kind: input, shape index: {}]   ;;  %s937_s3 = inlined_call_operand.hbm [shape: f32[32,32], index: 3, kind: input, shape index: {}]   ;;  %s938_s4 = inlined_call_operand.vmem [shape: f32[1,32], index: 4, kind: input, shape index: {}]   ;;  %s939_s5 = inlined_call_operand.vmem [shape: f32[32,16], index: 5, kind: input, shape index: {}]   ;;  %s940_s6 = inlined_call_operand.vmem [shape: f32[1,16], index: 6, kind: input, shape index: {}]   ;;  %s941_s7 = inlined_call_operand.hbm [shape: f32[8,32], index: 7, kind: input, shape index: {}]   ;;  %s942_s8 = inlined_call_operand.hbm [shape: f32[8,32], index: 8, kind: input, shape index: {}]   ;;  %s943_s9 = inlined_call_operand.vmem [shape: f32[1,8], index: 9, kind: input, shape index: {}]   ;;  %s944_s10 = inlined_call_operand.vmem [shape: f32[1,8], index: 10, kind: input, shape index: {}]   ;;  %s945_s11 = inlined_call_operand.hbm [shape: f32[16,16], index: 11, kind: output, shape index: {0}]   ;;  %s946_s12 = inlined_call_operand.hbm [shape: f32[1,1], index: 12, kind: output, shape index: {1}]  }
   0x1   :  { %19 = vsyncpa [#allocation6], 0 }
   0x2   :  { %20 = vsyncpa [#allocation4], 0  ;;  %s52_s23 = sshll.u32 %s941_s7, 4  ;;  %s53_s23 = int_to_ptr.hbm [resolvable:$true] %s52_s23 }
   0x3   :  { %21 = vsyncpa [#allocation10], 0  ;;  %s684_s24 = smov [#allocation5]   ;;  %s32_s28 = sshll.u32 %s937_s3, 4  ;;  %s33_s28 = int_to_ptr.hbm [resolvable:$true] %s32_s28 }
   0x4   :  { %s54_s25 = sshll.u32 %s684_s24, 4  ;;  %s685_s29 = smov [#allocation2]   ;;  %s55_s25 = int_to_ptr.vmem [resolvable:$true] %s54_s25 }
   0x5   :  { %57 = dma.hbm_to_vmem [thread:$0]  %s53_s23, 128, %s55_s25, [#allocation6]  }
   0x6   :  { %s34_s30 = sshll.u32 %s685_s29, 4  ;;  %s686_s13 = smov 128   ;;  %s35_s30 = int_to_ptr.vmem [resolvable:$true] %s34_s30 }
   0x7   :  { %s687_s14 = smov 8   ;;  %s63_s16 = sshll.u32 %s942_s8, 4  ;;  %s64_s16 = int_to_ptr.hbm [resolvable:$true] %s63_s16 }
   0x8   :  { %40 = dma.hbm_to_vmem [thread:$0]  %s33_s28, 512, %s35_s30, [#allocation3], %s686_s13, %s686_s13, %s687_s14  }
   0x9   :  { %s688_s17 = smov [#allocation7]  }
   0xa   :  { %s65_s18 = sshll.u32 %s688_s17, 4  ;;  %s66_s18 = int_to_ptr.vmem [resolvable:$true] %s65_s18 }
   0xb   :  { %68 = dma.hbm_to_vmem [thread:$0]  %s64_s16, 128, %s66_s18, [#allocation6]  }
   0xc   :  { %676 = dma.done.wait [#allocation3], 512  }
   0xd   :  { %677 = vsyncadd [#allocation3], 4294966784 }
   0xe   :  { %678 = dma.done.wait [#allocation6], 256  }
   0xf   :  { %679 = vsyncadd [#allocation6], 4294967040  ;;  %v90_v0 = vld [vmem:[%s935_s1 + $0x18] sm:$0xff]  ;;  %v89_v2 = vld [vmem:[%s935_s1 + $0x10] sm:$0xff]  ;;  %vm95_vm0 = vcmask 261120   ;;  %vm454_vm3 = vcmask 57344  }
  0x10   :  { %v292_v1 = vld [vmem:[#allocation2 + $0x18] sm:$0xff]  ;;  %114 = vmatpush.msra.mxu0 %v90_v0  ;;  %v291_v3 = vld [vmem:[#allocation2 + $0x10] sm:$0xff]  ;;  %v88_v4 = vld [vmem:[%s935_s1 + $0x8] sm:$0xff]  ;;  %513 = vmatpush.msra.mxu3 %v90_v0  ;;  %s689_s22 = smov 96   ;;  %s691_s23 = smov 120   ;;  %vm467_vm4 = vcmask 0  }
  0x11   :  { %309 = vmatpush.msra.mxu1 %v292_v1  ;;  %v290_v5 = vld [vmem:[#allocation2 + $0x8] sm:$0xff]  ;;  %v87_v7 = vld [vmem:[%s935_s1] sm:$0xff]  ;;  %v325_v30 = vld [vmem:[%s939_s5 + $0x18] sm:$0xff]  ;;  %s694_s24 = smov 64   ;;  %s695_s25 = smov 56   ;;  %vm385_vm5 = vcmask 64512  }
  0x12   :  { %115 = vmatpush.msra.mxu0 %v89_v2  ;;  %v392_v6 = vld [vmem:[#allocation7] sm:$0xff]  ;;  %v289_v8 = vld [vmem:[#allocation2] sm:$0xff]  ;;  %514 = vmatpush.msra.mxu3 %v89_v2  ;;  %v324_v63 = vld [vmem:[%s939_s5 + $0x10] sm:$0xff]  ;;  %s696_s26 = smov 88   ;;  %s697_s1 = smov 72   ;;  %vm388_vm6 = vcmask 130048  }
  0x13   :  { %310 = vmatpush.msra.mxu1 %v291_v3  ;;  %v394_v9 = vand.u32 2147483647, %v392_v6  ;;  %v85_v10 = vld [vmem:[%s934_s0] sm:$0xff]  ;;  %v86_v13 = vld [vmem:[%s934_s0 + $0x8] sm:$0xff]  ;;  %v393_v25 = vmax.f32 %v392_v6, 0.0  ;;  %348 = vmatpush.msra.mxu2 %v325_v30  ;;  %s698_s0 = smov [#allocation9]  }
  0x14   :  { %116 = vmatpush.msra.mxu0 %v88_v4  ;;  %515 = vmatpush.msra.mxu3 %v88_v4  ;;  %v429_v14 = vld [vmem:[%s944_s10] sm:$0x1]  ;;  %v323_v0 = vld [vmem:[%s939_s5 + $0x8] sm:$0xff]  ;;  %s487_s10 = sshll.u32 %s698_s0, 4  ;;  %s475_s18 = sshll.u32 %s945_s11, 4  ;;  %s488_s10 = int_to_ptr.vmem [resolvable:$true] %s487_s10  ;;  %s476_s18 = int_to_ptr.hbm [resolvable:$true] %s475_s18 }
  0x15   :  { %311 = vmatpush.msra.mxu1 %v290_v5  ;;  %v395_v11 = vsub.f32 0.0, %v394_v9  ;;  %v431_v16 = vand.u32 2147483647, %v429_v14  ;;  %v391_v27 = vld [vmem:[#allocation5] sm:$0xff]  ;;  %v430_v44 = vmax.f32 %v429_v14, 0.0  ;;  %349 = vmatpush.msra.mxu2 %v324_v63 }
  0x16   :  { %117 = vmatpush.msra.mxu0 %v87_v7  ;;  %516 = vmatpush.msra.mxu3 %v87_v7  ;;  %v412_v34 = vmul.f32 %v391_v27, %v391_v27  ;;  %v428_v47 = vld [vmem:[%s943_s9] sm:$0x1]  ;;  %s489_s9 = sshll.u32 %s946_s12, 4  ;;  %s699_s12 = smov [#allocation8]   ;;  %s490_s9 = int_to_ptr.hbm [resolvable:$true] %s489_s9 }
  0x17   :  { %312 = vmatpush.msra.mxu1 %v289_v8  ;;  %505 = vmatmul.msk.f32.vlgmr.msra.gmra.mxu0 %vm95_vm0, %v85_v10  ;;  %v396_v12 = vmul.f32 1.442695, %v395_v11  ;;  %v432_v19 = vsub.f32 0.0, %v431_v16  ;;  %v449_v51 = vmul.f32 %v428_v47, %v428_v47  ;;  %v322_v1 = vld [vmem:[%s939_s5] sm:$0xff]  ;;  %s690_s5 = smov 112   ;;  %s473_s15 = sshll.u32 %s699_s12, 4  ;;  %s474_s15 = int_to_ptr.vmem [resolvable:$true] %s473_s15 }
  0x18   :  { %507 = vmatmul.msk.f32.vlgmr.msra.gmra.mxu1 %vm95_vm0, %v85_v10  ;;  %506 = vmatmul.msk.f32.vlgmr.msra.gmra.mxu3 %vm95_vm0, %v86_v13  ;;  %v537_v2 = vld [vmem:[%s936_s2] ss:$0 sm:$0xff]  ;;  %s692_s2 = smov 80  }
  0x19   :  { %540 = vpow2.f32 %v396_v12  ;;  %v433_v21 = vmul.f32 1.442695, %v432_v19  ;;  %350 = vmatpush.msra.mxu2 %v323_v0  ;;  %v538_v3 = vld [vmem:[%s938_s4] ss:$0 sm:$0xff]  ;;  %s693_s4 = smov 104  }
  0x1a   :  { %v539_v47 = vld [vmem:[%s940_s6] ss:$0 sm:$0xff] }
  0x1b   :  { %351 = vmatpush.msra.mxu2 %v322_v1 }
  0x1f   :  { %v541_v15 = vpop.eup %540 }
  0x20   :  { %508 = vmatmul.msk.f32.gmra.mxu1 %vm95_vm0, %v86_v13  ;;  %v398_v17 = vadd.f32 1.0, %v541_v15  ;;  %v401_v18 = vmul.f32 -0.5, %v541_v15  ;;  %v404_v22 = vand.u32 2147483647, %v541_v15 }
  0x22   :  { %542 = vlog2.f32 %v398_v17  ;;  %v402_v20 = vadd.f32 1.0, %v401_v18  ;;  %vm405_vm1 = vcmp.lt.f32.partialorder %v404_v22, 0.0004427343 }
  0x23   :  { %544 = vpow2.f32 %v433_v21 }
  0x24   :  { %v403_v23 = vmul.f32 %v541_v15, %v402_v20 }
  0x28   :  { %v543_v24 = vpop.eup %542 }
  0x29   :  { %v400_v26 = vmul.f32 0.6931472, %v543_v24  ;;  %v545_v28 = vpop.eup %544 }
  0x2a   :  { %v435_v32 = vadd.f32 1.0, %v545_v28  ;;  %v438_v33 = vmul.f32 -0.5, %v545_v28  ;;  %v441_v38 = vand.u32 2147483647, %v545_v28 }
  0x2b   :  { %v406_v29 = vsel %vm405_vm1, %v403_v23, %v400_v26 }
  0x2c   :  { %v407_v31 = vadd.f32 %v406_v29, %v393_v25  ;;  %v439_v36 = vadd.f32 1.0, %v438_v33  ;;  %vm442_vm2 = vcmp.lt.f32.partialorder %v441_v38, 0.0004427343 }
  0x2e   :  { %546 = vlog2.f32 %v407_v31  ;;  %v411_v35 = vmul.f32 %v407_v31, %v407_v31  ;;  %v440_v40 = vmul.f32 %v545_v28, %v439_v36 }
  0x2f   :  { %548 = vlog2.f32 %v435_v32 }
  0x30   :  { %v413_v37 = vadd.f32 %v412_v34, %v411_v35 }
  0x32   :  { %v414_v43 = vmul.f32 0.5, %v413_v37 }
  0x34   :  { %v547_v39 = vpop.eup %546 }
  0x35   :  { %v549_v41 = vpop.eup %548  ;;  %v409_v42 = vmul.f32 0.6931472, %v547_v39 }
  0x36   :  { %v437_v45 = vmul.f32 0.6931472, %v549_v41 }
  0x37   :  { %v410_v46 = vsub.f32 0.0, %v409_v42 }
  0x38   :  { %v443_v48 = vsel %vm442_vm2, %v440_v40, %v437_v45 }
  0x39   :  { %v415_v49 = vadd.f32 %v414_v43, %v410_v46  ;;  %v444_v50 = vadd.f32 %v443_v48, %v430_v44 }
  0x3b   :  { %v511_v52 = vadd.f32 -0.5, %v415_v49  ;;  %550 = vlog2.f32 %v444_v50  ;;  %v448_v53 = vmul.f32 %v444_v50, %v444_v50 }
  0x3d   :  { %v417_v54 = vsel %vm95_vm0, %v511_v52, 0.0  ;;  %v450_v55 = vadd.f32 %v449_v51, %v448_v53 }
  0x3e   :  { %418 = vadd.xlane.f32.xlu2 %v417_v54 }
  0x3f   :  { %v451_v58 = vmul.f32 0.5, %v450_v55 }
  0x41   :  { %v551_v56 = vpop.eup %550 }
  0x42   :  { %v446_v57 = vmul.f32 0.6931472, %v551_v56 }
  0x44   :  { %v447_v59 = vsub.f32 0.0, %v446_v57 }
  0x46   :  { %v452_v60 = vadd.f32 %v451_v58, %v447_v59 }
  0x48   :  { %v512_v61 = vadd.f32 -0.5, %v452_v60 }
  0x4a   :  { %v455_v62 = vsel %vm454_vm3, %v512_v61, 0.0 }
  0x4b   :  { %456 = vadd.xlane.f32.xlu0 %v455_v62 }
  0x94   :  { %v119_v4 = vpop.f32.mrf.mxu0 }
  0x95   :  { %v314_v5 = vpop.f32.mrf.mxu1  ;;  %v824_v6 = vadd.f32 %v537_v2, %v119_v4 }
  0x96   :  { %v315_v7 = vadd.f32 %v538_v3, %v314_v5 }
  0x97   :  { %183 = vrot.lane.b32.xlu1 %v824_v6, %s689_s22  ;;  %151 = vrot.lane.b32.xlu2 %v824_v6, %s690_s5  ;;  %v842_v12 = vmul.f32 %v824_v6, %v824_v6 }
  0x98   :  { %v320_v8 = vmax.f32 %v315_v7, 0.0  ;;  %133 = vrot.lane.b32.xlu0 %v824_v6, %s691_s23 }
  0x9a   :  { %509 = vmatmul.msk.f32.vlgmr.msra.gmra.mxu2 %vm95_vm0, %v320_v8 }
  0x9b   :  { %v122_v13 = vpop.f32.mrf.mxu3 }
  0x9c   :  { %v861_v14 = vadd.f32 %v537_v2, %v122_v13 }
  0x9d   :  { %v317_v9 = vpop.f32.mrf.mxu1 }
  0x9e   :  { %v318_v10 = vadd.f32 %v538_v3, %v317_v9  ;;  %v876_v15 = vmul.f32 %v861_v14, %v861_v14 }
  0x9f   :  { %215 = vrot.lane.b32.xlu1 %v824_v6, %s692_s2  ;;  %167 = vrot.lane.b32.xlu2 %v824_v6, %s693_s4 }
  0xa0   :  { %v321_v11 = vmax.f32 %v318_v10, 0.0  ;;  %247 = vrot.lane.b32.xlu0 %v824_v6, %s694_s24 }
  0xa2   :  { %510 = vmatmul.msk.f32.gmra.mxu2 %vm95_vm0, %v321_v11 }
  0xa7   :  { %263 = vrot.lane.b32.xlu1 %v824_v6, %s695_s25  ;;  %199 = vrot.lane.b32.xlu2 %v824_v6, %s696_s26 }
  0xa8   :  { %159 = vrot.lane.b32.xlu0 %v842_v12, %s690_s5 }
  0xaf   :  { %231 = vrot.lane.b32.xlu2 %v824_v6, %s697_s1  ;;  %143 = vrot.lane.b32.xlu1 %v842_v12, %s691_s23 }
  0xb0   :  { %207 = vrot.lane.b32.xlu0 %v842_v12, %s696_s26 }
  0xb1   :  { %v419_v16 = vpop.xlane.xlu2 %418 }
  0xb2   :  { %v420_v19 = vrot.slane %v419_v16, 4 }
  0xb4   :  { %v421_v21 = vadd.f32 %v420_v19, %v419_v16 }
  0xb6   :  { %v422_v24 = vrot.slane %v421_v21, 2 }
  0xb7   :  { %255 = vrot.lane.b32.xlu2 %v842_v12, %s694_s24  ;;  %175 = vrot.lane.b32.xlu1 %v842_v12, %s693_s4 }
  0xb8   :  { %223 = vrot.lane.b32.xlu0 %v842_v12, %s692_s2  ;;  %v423_v27 = vadd.f32 %v422_v24, %v421_v21 }
  0xba   :  { %v424_v31 = vrot.slane %v423_v27, 1 }
  0xbc   :  { %v425_v35 = vadd.f32 %v424_v31, %v423_v27 }
  0xbe   :  { %v457_v18 = vpop.xlane.xlu0 %456  ;;  %517 = vpush %v425_v35 }
  0xbf   :  { %191 = vrot.lane.b32.xlu1 %v842_v12, %s689_s22  ;;  %153 = vrot.lane.b32.xlu2 %v861_v14, %s690_s5  ;;  %v458_v20 = vrot.slane %v457_v18, 4 }
  0xc0   :  { %135 = vrot.lane.b32.xlu0 %v861_v14, %s691_s23 }
  0xc1   :  { %v459_v22 = vadd.f32 %v458_v20, %v457_v18 }
  0xc3   :  { %v460_v25 = vrot.slane %v459_v22, 2 }
  0xc5   :  { %v461_v28 = vadd.f32 %v460_v25, %v459_v22 }
  0xc7   :  { %239 = vrot.lane.b32.xlu1 %v842_v12, %s697_s1  ;;  %217 = vrot.lane.b32.xlu2 %v861_v14, %s692_s2  ;;  %v462_v32 = vrot.slane %v461_v28, 1 }
  0xc8   :  { %169 = vrot.lane.b32.xlu0 %v861_v14, %s693_s4 }
  0xc9   :  { %v463_v36 = vadd.f32 %v462_v32, %v461_v28 }
  0xcb   :  { %519 = vpush %v463_v36 }
  0xcf   :  { %185 = vrot.lane.b32.xlu1 %v861_v14, %s689_s22  ;;  %241 = vrot.lane.b32.xlu2 %v876_v15, %s697_s1 }
  0xd0   :  { %233 = vrot.lane.b32.xlu0 %v861_v14, %s697_s1 }
  0xd7   :  { %201 = vrot.lane.b32.xlu1 %v861_v14, %s696_s26  ;;  %265 = vrot.lane.b32.xlu2 %v861_v14, %s695_s25 }
  0xd8   :  { %257 = vrot.lane.b32.xlu0 %v876_v15, %s694_s24 }
  0xdf   :  { %249 = vrot.lane.b32.xlu1 %v861_v14, %s694_s24 }
  0xe0   :  { %271 = vrot.lane.b32.xlu0 %v842_v12, %s695_s25 }
  0xe7   :  { %145 = vrot.lane.b32.xlu1 %v876_v15, %s691_s23 }
  0xef   :  { %161 = vrot.lane.b32.xlu1 %v876_v15, %s690_s5  ;;  %s518_s6 = spop %517 }
  0xf0   :  { %v427_v8 = vstv %s518_s6 }
  0xf1   :  { %v152_v17 = vpop.permute.xlu2 %151 }
  0xf7   :  { %177 = vrot.lane.b32.xlu1 %v876_v15, %s693_s4 }
  0xf9   :  { %v168_v23 = vpop.permute.xlu2 %167 }
  0xfc   :  { %s520_s29 = spop %519 }
  0xfd   :  { %v465_v9 = vstv %s520_s29 }
  0xfe   :  { %v466_v11 = vadd.f32 %v465_v9, %v427_v8 }
  0xff   :  { %193 = vrot.lane.b32.xlu1 %v876_v15, %s689_s22 }
 0x100   :  { %468 = vst.msk [vmem:[#allocation9] sm:$0x1] %vm467_vm4, %v466_v11 }
 0x101   :  { %v200_v33 = vpop.permute.xlu2 %199  ;;  %492 = dma.vmem_to_hbm [thread:$0]  %s488_s10, 16, %s490_s9, [#allocation10]  }
 0x107   :  { %209 = vrot.lane.b32.xlu1 %v876_v15, %s696_s26 }
 0x109   :  { %v184_v26 = vpop.permute.xlu1 %183  ;;  %v232_v43 = vpop.permute.xlu2 %231 }
 0x10a   :  { %v134_v29 = vpop.permute.xlu0 %133 }
 0x10b   :  { %v139_v30 = vadd.f32 %v134_v29, %v824_v6 }
 0x10d   :  { %v157_v34 = vadd.f32 %v152_v17, %v139_v30 }
 0x10f   :  { %v173_v37 = vadd.f32 %v168_v23, %v157_v34  ;;  %225 = vrot.lane.b32.xlu1 %v876_v15, %s692_s2 }
 0x111   :  { %v216_v38 = vpop.permute.xlu1 %215  ;;  %v189_v39 = vadd.f32 %v184_v26, %v173_v37  ;;  %v256_v62 = vpop.permute.xlu2 %255 }
 0x112   :  { %v248_v40 = vpop.permute.xlu0 %247 }
 0x113   :  { %v205_v41 = vadd.f32 %v200_v33, %v189_v39 }
 0x115   :  { %v221_v42 = vadd.f32 %v216_v38, %v205_v41 }
 0x117   :  { %v237_v44 = vadd.f32 %v232_v43, %v221_v42  ;;  %273 = vrot.lane.b32.xlu1 %v876_v15, %s695_s25 }
 0x119   :  { %v253_v45 = vadd.f32 %v248_v40, %v237_v44  ;;  %v264_v46 = vpop.permute.xlu1 %263  ;;  %v154_v2 = vpop.permute.xlu2 %153 }
 0x11a   :  { %v160_v49 = vpop.permute.xlu0 %159 }
 0x11b   :  { %v269_v48 = vadd.f32 %v264_v46, %v253_v45 }
 0x11d   :  { %v353_v50 = vpop.f32.mrf.mxu2  ;;  %v910_v51 = vmul.f32 0.1, %v269_v48 }
 0x11e   :  { %v354_v52 = vadd.f32 %v539_v47, %v353_v50 }
 0x11f   :  { %v283_v45 = vmul.f32 %v910_v51, %v910_v51 }
 0x120   :  { %v359_v53 = vmul.f32 1.442695, %v354_v52  ;;  %v913_v54 = vadd.f32 %v354_v52, %v910_v51 }
 0x121   :  { %v144_v55 = vpop.permute.xlu1 %143  ;;  %v218_v5 = vpop.permute.xlu2 %217 }
 0x122   :  { %552 = vpow2.f32 %v359_v53  ;;  %v208_v57 = vpop.permute.xlu0 %207  ;;  %v149_v30 = vadd.f32 %v144_v55, %v842_v12 }
 0x124   :  { %v165_v31 = vadd.f32 %v160_v49, %v149_v30 }
 0x125   :  { %v356_v56 = vpop.f32.mrf.mxu2 }
 0x126   :  { %v357_v58 = vadd.f32 %v539_v47, %v356_v56 }
 0x128   :  { %v553_v59 = vpop.eup %552  ;;  %v361_v60 = vmul.f32 1.442695, %v357_v58 }
 0x129   :  { %369 = vrot.lane.b32.xlu2 %v553_v59, %s691_s23  ;;  %v176_v61 = vpop.permute.xlu1 %175  ;;  %v242_v18 = vpop.permute.xlu2 %241 }
 0x12a   :  { %554 = vpow2.f32 %v361_v60  ;;  %v224_v0 = vpop.permute.xlu0 %223  ;;  %v181_v33 = vadd.f32 %v176_v61, %v165_v31 }
 0x130   :  { %v555_v63 = vpop.eup %554 }
 0x131   :  { %371 = vrot.lane.b32.xlu0 %v555_v63, %s691_s23  ;;  %v192_v1 = vpop.permute.xlu1 %191  ;;  %v266_v25 = vpop.permute.xlu2 %265 }
 0x132   :  { %v136_v3 = vpop.permute.xlu0 %135  ;;  %v197_v34 = vadd.f32 %v192_v1, %v181_v33 }
 0x133   :  { %v140_v6 = vadd.f32 %v136_v3, %v861_v14  ;;  %v365_v3 = vmul.f32 0.5, %v913_v54 }
 0x134   :  { %v213_v36 = vadd.f32 %v208_v57, %v197_v34 }
 0x135   :  { %v158_v13 = vadd.f32 %v154_v2, %v140_v6 }
 0x136   :  { %v229_v38 = vadd.f32 %v224_v0, %v213_v36 }
 0x139   :  { %v240_v4 = vpop.permute.xlu1 %239 }
 0x13a   :  { %v170_v10 = vpop.permute.xlu0 %169  ;;  %v245_v39 = vadd.f32 %v240_v4, %v229_v38 }
 0x13b   :  { %v174_v16 = vadd.f32 %v170_v10, %v158_v13 }
 0x13c   :  { %v261_v41 = vadd.f32 %v256_v62, %v245_v39 }
 0x141   :  { %v186_v7 = vpop.permute.xlu1 %185 }
 0x142   :  { %v190_v17 = vadd.f32 %v186_v7, %v174_v16  ;;  %v234_v22 = vpop.permute.xlu0 %233 }
 0x149   :  { %v202_v19 = vpop.permute.xlu1 %201 }
 0x14a   :  { %v206_v20 = vadd.f32 %v202_v19, %v190_v17  ;;  %v258_v35 = vpop.permute.xlu0 %257 }
 0x14c   :  { %v222_v21 = vadd.f32 %v218_v5, %v206_v20 }
 0x14e   :  { %v238_v23 = vadd.f32 %v234_v22, %v222_v21 }
 0x151   :  { %v250_v24 = vpop.permute.xlu1 %249 }
 0x152   :  { %v254_v14 = vadd.f32 %v250_v24, %v238_v23  ;;  %v272_v40 = vpop.permute.xlu0 %271 }
 0x153   :  { %v277_v43 = vadd.f32 %v272_v40, %v261_v41 }
 0x154   :  { %v270_v26 = vadd.f32 %v266_v25, %v254_v14 }
 0x155   :  { %v281_v44 = vmul.f32 0.1, %v277_v43 }
 0x156   :  { %v280_v27 = vmul.f32 0.1, %v270_v26 }
 0x157   :  { %v285_v46 = vsub.f32 %v281_v44, %v283_v45 }
 0x158   :  { %v364_v28 = vadd.f32 %v357_v58, %v280_v27  ;;  %v284_v62 = vmul.f32 %v280_v27, %v280_v27 }
 0x159   :  { %v146_v29 = vpop.permute.xlu1 %145  ;;  %v287_v48 = vmul.f32 1.1111112, %v285_v46 }
 0x15a   :  { %v150_v12 = vadd.f32 %v146_v29, %v876_v15  ;;  %v366_v6 = vmul.f32 0.5, %v364_v28 }
 0x161   :  { %v162_v32 = vpop.permute.xlu1 %161 }
 0x162   :  { %v166_v50 = vadd.f32 %v162_v32, %v150_v12 }
 0x169   :  { %v178_v37 = vpop.permute.xlu1 %177 }
 0x16a   :  { %v182_v53 = vadd.f32 %v178_v37, %v166_v50 }
 0x171   :  { %v194_v42 = vpop.permute.xlu1 %193 }
 0x172   :  { %v198_v51 = vadd.f32 %v194_v42, %v182_v53 }
 0x179   :  { %v210_v47 = vpop.permute.xlu1 %209 }
 0x17a   :  { %v214_v56 = vadd.f32 %v210_v47, %v198_v51 }
 0x181   :  { %v226_v55 = vpop.permute.xlu1 %225 }
 0x182   :  { %v230_v15 = vadd.f32 %v226_v55, %v214_v56 }
 0x183   :  { %v370_v49 = vpop.permute.xlu2 %369 }
 0x184   :  { %v375_v52 = vadd.f32 %v370_v49, %v287_v48  ;;  %v246_v57 = vadd.f32 %v242_v18, %v230_v15 }
 0x186   :  { %379 = vrot.lane.b32.xlu1 %v375_v52, %s687_s14  ;;  %v262_v59 = vadd.f32 %v258_v35, %v246_v57 }
 0x189   :  { %v274_v58 = vpop.permute.xlu1 %273 }
 0x18a   :  { %v278_v60 = vadd.f32 %v274_v58, %v262_v59 }
 0x18c   :  { %v282_v61 = vmul.f32 0.1, %v278_v60 }
 0x18e   :  { %v286_v63 = vsub.f32 %v282_v61, %v284_v62 }
 0x190   :  { %v288_v0 = vmul.f32 1.1111112, %v286_v63 }
 0x1a3   :  { %v372_v1 = vpop.permute.xlu0 %371 }
 0x1a4   :  { %v376_v2 = vadd.f32 %v372_v1, %v288_v0 }
 0x1a6   :  { %381 = vrot.lane.b32.xlu2 %v376_v2, %s687_s14 }
 0x1f8   :  { %v380_v4 = vpop.permute.xlu1 %379 }
 0x1f9   :  { %v386_v5 = vsel %vm385_vm5, %v365_v3, %v380_v4 }
 0x1fa   :  { %389 = vst.msk [vmem:[#allocation8] sm:$0xff] %vm388_vm6, %v386_v5 }
 0x200   :  { %v382_v7 = vpop.permute.xlu2 %381 }
 0x201   :  { %v387_v8 = vsel %vm385_vm5, %v366_v6, %v382_v7 }
 0x202   :  { %390 = vst.msk [vmem:[#allocation8 + $0x8] sm:$0xff] %vm388_vm6, %v387_v8 }
 0x203   :  { %481 = dma.vmem_to_hbm [thread:$0]  %s474_s15, 256, %s476_s18, [#allocation4], %s686_s13, %s686_s13, %s687_s14  }
 0x204   :  { %680 = dma.done.wait [#allocation4], 256  }
 0x205   :  { %681 = vsyncadd [#allocation4], 4294967040 }
 0x206   :  { %682 = dma.done.wait [#allocation10], 16  }
 0x207   :  { %683 = vsyncadd [#allocation10], 4294967280 }
 0x208   :  { %501 = vsyncpa [#allocation3], 1 }
 0x209   :  { %502 = vsyncpa [#allocation6], 1 }
 0x20a   :  { %503 = vsyncpa [#allocation4], 1 }
 0x20b   :  { %504 = vsyncpa [#allocation10], 1 }

</bundles_post_ra>
